<compile_context>
chip_gen: v6e
topology: v6e:2x2x1
jax: 0.10.0
libtpu: 0.0.40
codegen_flags: <defaults>
</compile_context>

<pallas_src>
import functools

import jax
import jax.numpy as jnp
from jax.experimental import pallas as pl
from jax.experimental.pallas import tpu as pltpu


def conv2d_relu(x, w, b, *, stride=1, padding=1):
    """Conv2d(KHxKW, stride=1, pad=padding) + bias + ReLU.  NCHW in / NCHW out.

    x: (N, C, H, W); w: (O, C, KH, KW); b: (O,).
    """
    if stride != 1:
        # TODO(synk): general stride needs a strided flat-window slice; the
        # reference module config uses stride=1.
        raise NotImplementedError("stride != 1 not supported by this kernel")

    N, C, H, W = x.shape
    O, _, KH, KW = w.shape
    Hp, Wp = H + 2 * padding, W + 2 * padding
    Ho, Wo = Hp - KH + 1, Wp - KW + 1
    HoWp = Ho * Wp            # lane-dense output row-pitch (garbage cols trimmed later)

    # ---- cheap wrapper prep (no im2col, no activation transposes) ----------
    # Zero-pad spatially, flatten H*W row-major.  A 3x3 tap (kh, kw) at output
    # (ho, wo) reads flat index (ho+kh)*Wp + (wo+kw) = (kh*Wp+kw) + (ho*Wp+wo),
    # so per tap a single contiguous flat slice of length Ho*Wp covers every
    # output position, laid out with row pitch Wp (the last Wp-Wo lanes of each
    # output row are wrapped garbage and are trimmed after the kernel).
    xp = jnp.pad(x, ((0, 0), (0, 0), (padding, padding), (padding, padding)))
    xflat = xp.reshape(N, C, Hp * Wp)
    need = (KH - 1) * Wp + (KW - 1) + HoWp      # max flat index touched + 1
    extra = max(0, need - Hp * Wp)
    if extra:
        xflat = jnp.pad(xflat, ((0, 0), (0, 0), (0, extra)))
    Lp = Hp * Wp + extra

    # Weights rearranged to (KH*KW, O, C) so the kernel grabs a ready (O, C)
    # slab per tap; bias as a column for lane-broadcast.  (Tiny: O*C*KH*KW.)
    w_taps = jnp.transpose(w, (2, 3, 0, 1)).reshape(KH * KW, O, C)
    b_col = b.reshape(O, 1)

    def kernel(x_ref, w_ref, b_ref, o_ref):
        # x_ref: (1, C, Lp) flattened zero-padded image
        # w_ref: (KH*KW, O, C)   (VMEM resident across grid steps)
        # b_ref: (O, 1)
        # o_ref: (1, O, Ho*Wp)   (lane-dense store)
        acc = jnp.zeros((O, HoWp), jnp.float32)
        for kh in range(KH):
            for kw in range(KW):
                start = kh * Wp + kw
                xs = x_ref[0, :, start:start + HoWp]        # (C, Ho*Wp)
                wk = w_ref[kh * KW + kw]                    # (O, C)
                acc = acc + jnp.dot(wk, xs, preferred_element_type=jnp.float32)
        acc = acc + b_ref[...]                              # bias, broadcast over lanes
        o_ref[0] = jnp.maximum(acc, 0.0).astype(o_ref.dtype)   # fused ReLU (NL='relu')

    # TODO(synk): at production sizes cast activations/weights to bfloat16 on
    # v6e/v7x (keep the f32 accumulate) and set vmem_limit_bytes explicitly for
    # v7x's 64 MiB VMEM; at this toy size f32 + default limits are fine.
    out_flat = pl.pallas_call(
        kernel,
        out_shape=jax.ShapeDtypeStruct((N, O, HoWp), x.dtype),
        grid_spec=pltpu.PrefetchScalarGridSpec(
            num_scalar_prefetch=0,
            grid=(N,),                                      # >=2 parallel blocks (v7x: both TCs)
            in_specs=[
                pl.BlockSpec((1, C, Lp), lambda n: (n, 0, 0)),
                pl.BlockSpec((KH * KW, O, C), lambda n: (0, 0, 0)),
                pl.BlockSpec((O, 1), lambda n: (0, 0)),
            ],
            out_specs=pl.BlockSpec((1, O, HoWp), lambda n: (n, 0, 0)),
        ),
        compiler_params=pltpu.CompilerParams(
            dimension_semantics=("parallel",)),
    )(xflat, w_taps, b_col)

    # (N, O, Ho*Wp) -> (N, O, Ho, Wp) is a free reshape; trim the Wp-Wo wrapped
    # garbage columns.  Result is already NCHW: no data-moving transpose.
    return out_flat.reshape(N, O, Ho, Wp)[:, :, :, :Wo]


if __name__ == "__main__":
    # Module config: Conv2d(in_channels=4, out_channels=8, kernel_size=3,
    #                       stride=1, NL='relu', same_padding=True, bn=False)
    in_channels, out_channels, kernel_size = 4, 8, 3
    stride, padding = 1, (kernel_size - 1) // 2   # same_padding=True

    key = jax.random.PRNGKey(0)
    kx, kw_, kb = jax.random.split(key, 3)

    # Deterministic parameter init (kaiming-uniform-like bound, PyTorch default)
    fan_in = in_channels * kernel_size * kernel_size
    bound = 1.0 / (fan_in ** 0.5)
    w = jax.random.uniform(kw_, (out_channels, in_channels, kernel_size, kernel_size),
                           jnp.float32, -bound, bound)
    b = jax.random.uniform(kb, (out_channels,), jnp.float32, -bound, bound)

    # Input: NCHW (2, 4, 16, 16)
    x = jax.random.normal(kx, (2, in_channels, 16, 16), jnp.float32)

    conv = jax.jit(functools.partial(conv2d_relu, stride=stride, padding=padding))
    out = jax.block_until_ready(conv(x, w, b))

    # Reference: XLA conv (NCHW / OIHW) + bias + ReLU.
    ref = jax.lax.conv_general_dilated(
        x, w, window_strides=(stride, stride),
        padding=[(padding, padding), (padding, padding)],
        dimension_numbers=("NCHW", "OIHW", "NCHW"))
    ref = jnp.maximum(ref + b[None, :, None, None], 0.0)

    assert out.shape == (2, out_channels, 16, 16), out.shape
    max_err = float(jnp.abs(out - ref).max())
    assert jnp.allclose(out, ref, rtol=1e-4, atol=1e-4), max_err

    # TODO(synk): BatchNorm2d branch (bn=True) and PReLU branch (NL='prelu') are
    # not exercised by this config (bn=False, NL='relu') and are omitted.
    print("KERNEL_OK")
</pallas_src>

<mosaic_0001>
module attributes {stable_mosaic.version = 11 : i64} {
  func.func @kernel(%arg0: i32, %arg1: memref<1x4x326xf32, #tpu.memory_space<vmem>>, %arg2: memref<9x8x4xf32, #tpu.memory_space<vmem>>, %arg3: memref<8x1xf32, #tpu.memory_space<vmem>>, %arg4: memref<1x8x288xf32, #tpu.memory_space<vmem>>) attributes {dimension_semantics = [#tpu.dimension_semantics<parallel>], iteration_bounds = array<i64: 2>, scalar_prefetch = 0 : i64, scratch_operands = 0 : i64, tpu.core_type = #tpu.core_type<tc>, window_params = [{transform_indices = @transform_0, window_bounds = array<i64: 1, 4, 326>}, {pipeline_mode = #tpu.pipeline_mode<synchronous>, transform_indices = @transform_1, window_bounds = array<i64: 9, 8, 4>}, {pipeline_mode = #tpu.pipeline_mode<synchronous>, transform_indices = @transform_2, window_bounds = array<i64: 8, 1>}, {transform_indices = @transform_3, window_bounds = array<i64: 1, 8, 288>}]} {
    %cst = arith.constant 0.000000e+00 : f32
    %0 = vector.broadcast %cst : f32 to vector<8x288xf32>
    %c0 = arith.constant 0 : index
    %c0_0 = arith.constant 0 : index
    %c0_1 = arith.constant 0 : index
    %1 = vector.load %arg1[%c0, %c0_0, %c0_1] : memref<1x4x326xf32, #tpu.memory_space<vmem>>, vector<1x4x288xf32>
    %2 = vector.shape_cast %1 : vector<1x4x288xf32> to vector<4x288xf32>
    %c0_2 = arith.constant 0 : index
    %c0_3 = arith.constant 0 : index
    %c0_4 = arith.constant 0 : index
    %3 = vector.load %arg2[%c0_2, %c0_3, %c0_4] : memref<9x8x4xf32, #tpu.memory_space<vmem>>, vector<1x8x4xf32>
    %4 = vector.shape_cast %3 : vector<1x8x4xf32> to vector<8x4xf32>
    %cst_5 = arith.constant dense<0.000000e+00> : vector<8x288xf32>
    %5 = tpu.matmul %4, %2, %cst_5 {dimension_numbers = #tpu.dot_dimension_numbers<[1], [0], [0], [1], [0, 0, 1, 1], [], []>} : vector<8x4xf32>, vector<4x288xf32>, vector<8x288xf32> -> vector<8x288xf32>
    %6 = arith.addf %0, %5 : vector<8x288xf32>
    %c0_6 = arith.constant 0 : index
    %c0_7 = arith.constant 0 : index
    %c1 = arith.constant 1 : index
    %7 = vector.load %arg1[%c0_6, %c0_7, %c1] : memref<1x4x326xf32, #tpu.memory_space<vmem>>, vector<1x4x288xf32>
    %8 = vector.shape_cast %7 : vector<1x4x288xf32> to vector<4x288xf32>
    %c1_8 = arith.constant 1 : index
    %c0_9 = arith.constant 0 : index
    %c0_10 = arith.constant 0 : index
    %9 = vector.load %arg2[%c1_8, %c0_9, %c0_10] : memref<9x8x4xf32, #tpu.memory_space<vmem>>, vector<1x8x4xf32>
    %10 = vector.shape_cast %9 : vector<1x8x4xf32> to vector<8x4xf32>
    %cst_11 = arith.constant dense<0.000000e+00> : vector<8x288xf32>
    %11 = tpu.matmul %10, %8, %cst_11 {dimension_numbers = #tpu.dot_dimension_numbers<[1], [0], [0], [1], [0, 0, 1, 1], [], []>} : vector<8x4xf32>, vector<4x288xf32>, vector<8x288xf32> -> vector<8x288xf32>
    %12 = arith.addf %6, %11 : vector<8x288xf32>
    %c0_12 = arith.constant 0 : index
    %c0_13 = arith.constant 0 : index
    %c2 = arith.constant 2 : index
    %13 = vector.load %arg1[%c0_12, %c0_13, %c2] : memref<1x4x326xf32, #tpu.memory_space<vmem>>, vector<1x4x288xf32>
    %14 = vector.shape_cast %13 : vector<1x4x288xf32> to vector<4x288xf32>
    %c2_14 = arith.constant 2 : index
    %c0_15 = arith.constant 0 : index
    %c0_16 = arith.constant 0 : index
    %15 = vector.load %arg2[%c2_14, %c0_15, %c0_16] : memref<9x8x4xf32, #tpu.memory_space<vmem>>, vector<1x8x4xf32>
    %16 = vector.shape_cast %15 : vector<1x8x4xf32> to vector<8x4xf32>
    %cst_17 = arith.constant dense<0.000000e+00> : vector<8x288xf32>
    %17 = tpu.matmul %16, %14, %cst_17 {dimension_numbers = #tpu.dot_dimension_numbers<[1], [0], [0], [1], [0, 0, 1, 1], [], []>} : vector<8x4xf32>, vector<4x288xf32>, vector<8x288xf32> -> vector<8x288xf32>
    %18 = arith.addf %12, %17 : vector<8x288xf32>
    %c0_18 = arith.constant 0 : index
    %c0_19 = arith.constant 0 : index
    %c18 = arith.constant 18 : index
    %19 = vector.load %arg1[%c0_18, %c0_19, %c18] : memref<1x4x326xf32, #tpu.memory_space<vmem>>, vector<1x4x288xf32>
    %20 = vector.shape_cast %19 : vector<1x4x288xf32> to vector<4x288xf32>
    %c3 = arith.constant 3 : index
    %c0_20 = arith.constant 0 : index
    %c0_21 = arith.constant 0 : index
    %21 = vector.load %arg2[%c3, %c0_20, %c0_21] : memref<9x8x4xf32, #tpu.memory_space<vmem>>, vector<1x8x4xf32>
    %22 = vector.shape_cast %21 : vector<1x8x4xf32> to vector<8x4xf32>
    %cst_22 = arith.constant dense<0.000000e+00> : vector<8x288xf32>
    %23 = tpu.matmul %22, %20, %cst_22 {dimension_numbers = #tpu.dot_dimension_numbers<[1], [0], [0], [1], [0, 0, 1, 1], [], []>} : vector<8x4xf32>, vector<4x288xf32>, vector<8x288xf32> -> vector<8x288xf32>
    %24 = arith.addf %18, %23 : vector<8x288xf32>
    %c0_23 = arith.constant 0 : index
    %c0_24 = arith.constant 0 : index
    %c19 = arith.constant 19 : index
    %25 = vector.load %arg1[%c0_23, %c0_24, %c19] : memref<1x4x326xf32, #tpu.memory_space<vmem>>, vector<1x4x288xf32>
    %26 = vector.shape_cast %25 : vector<1x4x288xf32> to vector<4x288xf32>
    %c4 = arith.constant 4 : index
    %c0_25 = arith.constant 0 : index
    %c0_26 = arith.constant 0 : index
    %27 = vector.load %arg2[%c4, %c0_25, %c0_26] : memref<9x8x4xf32, #tpu.memory_space<vmem>>, vector<1x8x4xf32>
    %28 = vector.shape_cast %27 : vector<1x8x4xf32> to vector<8x4xf32>
    %cst_27 = arith.constant dense<0.000000e+00> : vector<8x288xf32>
    %29 = tpu.matmul %28, %26, %cst_27 {dimension_numbers = #tpu.dot_dimension_numbers<[1], [0], [0], [1], [0, 0, 1, 1], [], []>} : vector<8x4xf32>, vector<4x288xf32>, vector<8x288xf32> -> vector<8x288xf32>
    %30 = arith.addf %24, %29 : vector<8x288xf32>
    %c0_28 = arith.constant 0 : index
    %c0_29 = arith.constant 0 : index
    %c20 = arith.constant 20 : index
    %31 = vector.load %arg1[%c0_28, %c0_29, %c20] : memref<1x4x326xf32, #tpu.memory_space<vmem>>, vector<1x4x288xf32>
    %32 = vector.shape_cast %31 : vector<1x4x288xf32> to vector<4x288xf32>
    %c5 = arith.constant 5 : index
    %c0_30 = arith.constant 0 : index
    %c0_31 = arith.constant 0 : index
    %33 = vector.load %arg2[%c5, %c0_30, %c0_31] : memref<9x8x4xf32, #tpu.memory_space<vmem>>, vector<1x8x4xf32>
    %34 = vector.shape_cast %33 : vector<1x8x4xf32> to vector<8x4xf32>
    %cst_32 = arith.constant dense<0.000000e+00> : vector<8x288xf32>
    %35 = tpu.matmul %34, %32, %cst_32 {dimension_numbers = #tpu.dot_dimension_numbers<[1], [0], [0], [1], [0, 0, 1, 1], [], []>} : vector<8x4xf32>, vector<4x288xf32>, vector<8x288xf32> -> vector<8x288xf32>
    %36 = arith.addf %30, %35 : vector<8x288xf32>
    %c0_33 = arith.constant 0 : index
    %c0_34 = arith.constant 0 : index
    %c36 = arith.constant 36 : index
    %37 = vector.load %arg1[%c0_33, %c0_34, %c36] : memref<1x4x326xf32, #tpu.memory_space<vmem>>, vector<1x4x288xf32>
    %38 = vector.shape_cast %37 : vector<1x4x288xf32> to vector<4x288xf32>
    %c6 = arith.constant 6 : index
    %c0_35 = arith.constant 0 : index
    %c0_36 = arith.constant 0 : index
    %39 = vector.load %arg2[%c6, %c0_35, %c0_36] : memref<9x8x4xf32, #tpu.memory_space<vmem>>, vector<1x8x4xf32>
    %40 = vector.shape_cast %39 : vector<1x8x4xf32> to vector<8x4xf32>
    %cst_37 = arith.constant dense<0.000000e+00> : vector<8x288xf32>
    %41 = tpu.matmul %40, %38, %cst_37 {dimension_numbers = #tpu.dot_dimension_numbers<[1], [0], [0], [1], [0, 0, 1, 1], [], []>} : vector<8x4xf32>, vector<4x288xf32>, vector<8x288xf32> -> vector<8x288xf32>
    %42 = arith.addf %36, %41 : vector<8x288xf32>
    %c0_38 = arith.constant 0 : index
    %c0_39 = arith.constant 0 : index
    %c37 = arith.constant 37 : index
    %43 = vector.load %arg1[%c0_38, %c0_39, %c37] : memref<1x4x326xf32, #tpu.memory_space<vmem>>, vector<1x4x288xf32>
    %44 = vector.shape_cast %43 : vector<1x4x288xf32> to vector<4x288xf32>
    %c7 = arith.constant 7 : index
    %c0_40 = arith.constant 0 : index
    %c0_41 = arith.constant 0 : index
    %45 = vector.load %arg2[%c7, %c0_40, %c0_41] : memref<9x8x4xf32, #tpu.memory_space<vmem>>, vector<1x8x4xf32>
    %46 = vector.shape_cast %45 : vector<1x8x4xf32> to vector<8x4xf32>
    %cst_42 = arith.constant dense<0.000000e+00> : vector<8x288xf32>
    %47 = tpu.matmul %46, %44, %cst_42 {dimension_numbers = #tpu.dot_dimension_numbers<[1], [0], [0], [1], [0, 0, 1, 1], [], []>} : vector<8x4xf32>, vector<4x288xf32>, vector<8x288xf32> -> vector<8x288xf32>
    %48 = arith.addf %42, %47 : vector<8x288xf32>
    %c0_43 = arith.constant 0 : index
    %c0_44 = arith.constant 0 : index
    %c38 = arith.constant 38 : index
    %49 = vector.load %arg1[%c0_43, %c0_44, %c38] : memref<1x4x326xf32, #tpu.memory_space<vmem>>, vector<1x4x288xf32>
    %50 = vector.shape_cast %49 : vector<1x4x288xf32> to vector<4x288xf32>
    %c8 = arith.constant 8 : index
    %c0_45 = arith.constant 0 : index
    %c0_46 = arith.constant 0 : index
    %51 = vector.load %arg2[%c8, %c0_45, %c0_46] : memref<9x8x4xf32, #tpu.memory_space<vmem>>, vector<1x8x4xf32>
    %52 = vector.shape_cast %51 : vector<1x8x4xf32> to vector<8x4xf32>
    %cst_47 = arith.constant dense<0.000000e+00> : vector<8x288xf32>
    %53 = tpu.matmul %52, %50, %cst_47 {dimension_numbers = #tpu.dot_dimension_numbers<[1], [0], [0], [1], [0, 0, 1, 1], [], []>} : vector<8x4xf32>, vector<4x288xf32>, vector<8x288xf32> -> vector<8x288xf32>
    %54 = arith.addf %48, %53 : vector<8x288xf32>
    %c0_48 = arith.constant 0 : index
    %c0_49 = arith.constant 0 : index
    %55 = vector.load %arg3[%c0_48, %c0_49] : memref<8x1xf32, #tpu.memory_space<vmem>>, vector<8x1xf32>
    %56 = vector.broadcast %55 : vector<8x1xf32> to vector<8x288xf32>
    %57 = arith.addf %54, %56 : vector<8x288xf32>
    %cst_50 = arith.constant 0.000000e+00 : f32
    %58 = vector.broadcast %cst_50 : f32 to vector<8x288xf32>
    %59 = arith.maximumf %57, %58 : vector<8x288xf32>
    %c0_51 = arith.constant 0 : index
    %c0_52 = arith.constant 0 : index
    %c0_53 = arith.constant 0 : index
    %60 = vector.load %arg4[%c0_51, %c0_52, %c0_53] : memref<1x8x288xf32, #tpu.memory_space<vmem>>, vector<1x8x288xf32>
    %61 = vector.shape_cast %60 : vector<1x8x288xf32> to vector<8x288xf32>
    %62 = vector.shape_cast %59 : vector<8x288xf32> to vector<1x8x288xf32>
    tpu.vector_store %arg4[%c0_51, %c0_52, %c0_53], %62 {strides = array<i32>} : memref<1x8x288xf32, #tpu.memory_space<vmem>>, vector<1x8x288xf32>,
    return
  }
  func.func @transform_0(%arg0: i32) -> (i32, i32, i32) {
    %c0_i32 = arith.constant 0 : i32
    %c0_i32_0 = arith.constant 0 : i32
    %c0_i32_1 = arith.constant 0 : i32
    return %arg0, %c0_i32, %c0_i32_0 : i32, i32, i32
  }
  func.func @transform_1(%arg0: i32) -> (i32, i32, i32) {
    %c0_i32 = arith.constant 0 : i32
    %c0_i32_0 = arith.constant 0 : i32
    %c0_i32_1 = arith.constant 0 : i32
    %c0_i32_2 = arith.constant 0 : i32
    return %c0_i32, %c0_i32_0, %c0_i32_1 : i32, i32, i32
  }
  func.func @transform_2(%arg0: i32) -> (i32, i32) {
    %c0_i32 = arith.constant 0 : i32
    %c0_i32_0 = arith.constant 0 : i32
    %c0_i32_1 = arith.constant 0 : i32
    return %c0_i32, %c0_i32_0 : i32, i32
  }
  func.func @transform_3(%arg0: i32) -> (i32, i32, i32) {
    %c0_i32 = arith.constant 0 : i32
    %c0_i32_0 = arith.constant 0 : i32
    %c0_i32_1 = arith.constant 0 : i32
    return %arg0, %c0_i32, %c0_i32_0 : i32, i32, i32
  }
}

</mosaic_0001>

<bundles_post_ra>
// kernel: conv2d_relu.1
= control target key start
LH: loop header
LB: loop body
LE: loop exit
PB: predicated region body
PF: predicated region fallthrough
CT: control target
= control target key end

     0   :  { %s1931_s12 = smov 0   ;;  %s2104_s0 = inlined_call_operand.vmem [shape: f32[2,4,326], index: 0, kind: input, shape index: {}]   ;;  %s2105_s1 = inlined_call_operand.vmem [shape: f32[9,8,4], index: 1, kind: input, shape index: {}]   ;;  %s2106_s2 = inlined_call_operand.vmem [shape: f32[8,1], index: 2, kind: input, shape index: {}]   ;;  %s2107_s3 = inlined_call_operand.vmem [shape: f32[2,8,288], index: 3, kind: output, shape index: {}]  }
   0x1 LB: > { %s1744_s13 = sadd.s32 4294967295, %s1898_s12   ;;  %p1748_p0 = scmp.ge.s32.totalorder %s1898_s12, 1  ;;  %s1898_s12 = sphi %s1931_s12, %s13_s12  }
   0x2   : > { %p137_p1 = scmp.lt.s32.totalorder %s1898_s12, 3 }
   0x4   : > { %p138_p2 = pnand %p1748_p0, %p137_p1 }
   0x5   : > { %p161_p3 = scmp.lt.s32.totalorder (!%p138_p2), %s1744_s13, 1  ;;  %s1902_s18 = smov (!%p138_p2), 127  }
   0x6   : > { %141 = sbr.rel (%p138_p2) target bundleno = 380 (0x17c), region = 32  ;;  %s1903_s19 = smov (!%p138_p2), 126  }
   0x7   : > { %s1904_s20 = smov (!%p138_p2), 110   ;;  %s1905_s21 = smov (!%p138_p2), 109  }
   0x8   : > { %s1906_s22 = smov (!%p138_p2), 108   ;;  %s1907_s23 = smov (!%p138_p2), 92  }
   0x9   : > { %s1909_s24 = smov (!%p138_p2), 91   ;;  %s1910_s25 = smov (!%p138_p2), 90  }
   0xb   : > { %v1900_v0 = vmov 0.0   ;;  %vm1901_vm0 = vmmov 0   ;;  %s2109_s13 = smov (!%p161_p3, %s1744_s13), 1  ;;  %v1908_v10 = vmov 0   ;;  %v1673_v12 = vld [vmem:[%s2106_s2] sm:$0xff]  ;;  %vm192_vm1 = vcmask 1043456  }
   0xc   : > { %1824 = vmatprep.subr.mxu1 %v1900_v0  ;;  %1826 = vmatprep.mubr.msk.f32.mxu1 %vm1901_vm0, %v1900_v0  ;;  %s1869_s14 = smul.u32 12, %s2109_s13  ;;  %v1751_v13 = vld [vmem:[%s2105_s1 + $0x8] sm:$0xff]  ;;  %vm188_vm2 = vcmask 31744   ;;  %v173_v16 = vld [vmem:[%s2105_s1] sm:$0xff]  ;;  %vm185_vm3 = vcmask 1039360   ;;  %v1762_v19 = vld [vmem:[%s2105_s1 + $0x10] sm:$0xff] }
   0xd   : > { %263 = vmatprep.mubr.f32.mxu0 %v1900_v0  ;;  %1890 = vset.pattern.permute.xlu0 %v1908_v10  ;;  %vm503_vm4 = vcmask 1031168   ;;  %v1768_v26 = vld [vmem:[%s2105_s1 + $0x18] sm:$0xff]  ;;  %vm672_vm5 = vcmask 900096   ;;  %vm841_vm6 = vcmask 891904   ;;  %v1774_v35 = vld [vmem:[%s2105_s1 + $0x20] sm:$0xff]  ;;  %vm1010_vm7 = vcmask 883712  }
   0xe   : > { %s1949_s17 = scalar_lea.vmem %s2104_s0, %s1869_s14  ;;  %v1780_v40 = vld [vmem:[%s2105_s1 + $0x28] sm:$0xff]  ;;  %vm1179_vm8 = vcmask 752640   ;;  %v1786_v45 = vld [vmem:[%s2105_s1 + $0x30] sm:$0xff]  ;;  %vm1348_vm9 = vcmask 744448   ;;  %v1792_v50 = vld [vmem:[%s2105_s1 + $0x38] sm:$0xff]  ;;  %vm1517_vm10 = vcmask 736256  }
   0xf   : > { %v172_v1 = vld [vmem:[%s1949_s17 + $0x8] sm:$0xf]  ;;  %v1953_v2 = vld [vmem:[%s1949_s17] sm:$0xff]  ;;  %vm1687_vm11 = vcmask 261120  }
  0x10   : > { %183 = vrot.lane.b32.xlu0 %v172_v1, %s1902_s18  ;;  %179 = vrot.lane.b32.xlu1 %v1953_v2, %s1902_s18  ;;  %v491_v3 = vld [vmem:[%s1949_s17 + $0x8] sm:$0xf]  ;;  %v1959_v4 = vcombine.high %v1953_v2, %v1953_v2  ;;  %v1798_v57 = vld [vmem:[%s2105_s1 + $0x40] sm:$0xff] }
  0x11   : > { %v660_v5 = vld [vmem:[%s1949_s17 + $0x8] sm:$0xf] }
  0x12   : > { %v829_v6 = vld [vmem:[%s1949_s17 + $0x8] sm:$0xf] }
  0x13   : > { %v998_v7 = vld [vmem:[%s1949_s17 + $0x8] sm:$0xf] }
  0x14   : > { %501 = vrot.lane.b32.xlu0 %v491_v3, %s1903_s19  ;;  %497 = vrot.lane.b32.xlu1 %v1953_v2, %s1903_s19  ;;  %v1167_v8 = vld [vmem:[%s1949_s17 + $0x8] sm:$0xf] }
  0x15   : > { %v1336_v9 = vld [vmem:[%s1949_s17 + $0x8] sm:$0xf] }
  0x16   : > { %v1505_v11 = vld [vmem:[%s1949_s17 + $0x8] sm:$0xf] }
  0x18   : > { %499 = vrot.lane.b32.xlu1 %v1959_v4, %s1903_s19  ;;  %181 = vrot.lane.b32.xlu0 %v1959_v4, %s1902_s18 }
  0x1c   : > { %670 = vrot.lane.b32.xlu1 %v660_v5, %s1904_s20  ;;  %668 = vrot.lane.b32.xlu0 %v1959_v4, %s1904_s20 }
  0x20   : > { %837 = vrot.lane.b32.xlu1 %v1959_v4, %s1905_s21  ;;  %666 = vrot.lane.b32.xlu0 %v1953_v2, %s1904_s20 }
  0x24   : > { %835 = vrot.lane.b32.xlu1 %v1953_v2, %s1905_s21  ;;  %839 = vrot.lane.b32.xlu0 %v829_v6, %s1905_s21  ;;  %s1870_s21 = smul.u32 24, %s2109_s13 }
  0x28   : > { %1008 = vrot.lane.b32.xlu1 %v998_v7, %s1906_s22  ;;  %1006 = vrot.lane.b32.xlu0 %v1959_v4, %s1906_s22 }
  0x2c   : > { %1175 = vrot.lane.b32.xlu1 %v1959_v4, %s1907_s23  ;;  %1004 = vrot.lane.b32.xlu0 %v1953_v2, %s1906_s22 }
  0x30   : > { %1173 = vrot.lane.b32.xlu1 %v1953_v2, %s1907_s23  ;;  %1177 = vrot.lane.b32.xlu0 %v1167_v8, %s1907_s23 }
  0x34   : > { %1346 = vrot.lane.b32.xlu1 %v1336_v9, %s1909_s24  ;;  %1344 = vrot.lane.b32.xlu0 %v1959_v4, %s1909_s24 }
  0x38   : > { %1513 = vrot.lane.b32.xlu1 %v1959_v4, %s1910_s25  ;;  %1342 = vrot.lane.b32.xlu0 %v1953_v2, %s1909_s24  ;;  %s170_s24 = scalar_lea.vmem %s2107_s3, %s1870_s21 }
  0x3c   : > { %1511 = vrot.lane.b32.xlu1 %v1953_v2, %s1910_s25  ;;  %1515 = vrot.lane.b32.xlu0 %v1505_v11, %s1910_s25 }
  0x40   : > { %1676 = vperm.xlu0 %1890, %v1673_v12  }
  0x82   : > { %v184_v14 = vpop.permute.xlu0 %183  ;;  %v180_v15 = vpop.permute.xlu1 %179 }
  0x83   : > { %1825 = vmatpush3.msk.msra.mxu1 %vm192_vm1, %v184_v14 }
  0x84   : > { %1827 = vmatmul.mubr.msk.f32.vlgmr.msra.gmra.mxu1 %vm188_vm2, %v1751_v13  ;;  %1829 = vmatprep.subr.mxu1 %v1900_v0 }
  0x85   : > { %1830 = vmatpush3.msk.msra.mxu1 %vm192_vm1, %v172_v1  ;;  %1831 = vmatprep.mubr.msk.f32.mxu1 %vm1901_vm0, %v1900_v0 }
  0x86   : > { %v502_v17 = vpop.permute.xlu0 %501  ;;  %v498_v18 = vpop.permute.xlu1 %497  ;;  %1834 = vmatprep.subr.mxu1 %v1900_v0 }
  0x88   : > { %1832 = vmatmul.mubr.msk.f32.vlgmr.msra.gmra.mxu1 %vm188_vm2, %v173_v16 }
  0x89   : > { %1835 = vmatpush3.msk.msra.mxu1 %vm192_vm1, %v502_v17  ;;  %1836 = vmatprep.mubr.msk.f32.mxu1 %vm1901_vm0, %v1900_v0 }
  0x8a   : > { %v500_v20 = vpop.permute.xlu1 %499  ;;  %v182_v21 = vpop.permute.xlu0 %181  ;;  %1839 = vmatprep.subr.mxu1 %v1900_v0 }
  0x8b   : > { %v187_v22 = vsel %vm185_vm3, %v182_v21, %v184_v14  ;;  %v186_v23 = vsel %vm185_vm3, %v180_v15, %v182_v21  ;;  %v505_v27 = vsel %vm503_vm4, %v500_v20, %v502_v17  ;;  %v504_v28 = vsel %vm503_vm4, %v498_v18, %v500_v20 }
  0x8c   : > { %1752 = vmatprep.subr.msk.mxu0 %vm192_vm1, %v187_v22  ;;  %1837 = vmatmul.mubr.msk.f32.vlgmr.msra.gmra.mxu1 %vm188_vm2, %v1762_v19 }
  0x8d   : > { %1753 = vmatpush1.msk.msra.mxu0 %vm192_vm1, %v186_v23  ;;  %1841 = vmatprep.mubr.msk.f32.mxu1 %vm1901_vm0, %v1900_v0 }
  0x8e   : > { %v671_v24 = vpop.permute.xlu1 %670  ;;  %1754 = vmatmul.mubr.msk.f32.vlgmr.msra.gmra.mxu0 %vm188_vm2, %v1751_v13  ;;  %1757 = vmatprep.subr.msk.mxu0 %vm192_vm1, %v1959_v4  ;;  %v669_v25 = vpop.permute.xlu0 %668 }
  0x8f   : > { %1758 = vmatpush1.msk.msra.mxu0 %vm192_vm1, %v1953_v2  ;;  %1840 = vmatpush3.msk.msra.mxu1 %vm192_vm1, %v671_v24  ;;  %v674_v31 = vsel %vm672_vm5, %v669_v25, %v671_v24 }
  0x90   : > { %1763 = vmatprep.subr.msk.mxu0 %vm192_vm1, %v505_v27  ;;  %413 = vmatprep.mubr.f32.mxu0 %v1900_v0 }
  0x91   : > { %1844 = vmatprep.subr.mxu1 %v1900_v0  ;;  %1842 = vmatmul.mubr.msk.f32.vlgmr.msra.gmra.mxu1 %vm188_vm2, %v1768_v26 }
  0x92   : > { %v838_v29 = vpop.permute.xlu1 %837  ;;  %1759 = vmatmul.mubr.msk.f32.vlgmr.msra.gmra.mxu0 %vm188_vm2, %v173_v16  ;;  %v667_v30 = vpop.permute.xlu0 %666  ;;  %1846 = vmatprep.mubr.msk.f32.mxu1 %vm1901_vm0, %v1900_v0 }
  0x93   : > { %1764 = vmatpush1.msk.msra.mxu0 %vm192_vm1, %v504_v28  ;;  %579 = vmatprep.mubr.f32.mxu0 %v1900_v0  ;;  %v673_v32 = vsel %vm672_vm5, %v667_v30, %v669_v25 }
  0x94   : > { %1769 = vmatprep.subr.msk.mxu0 %vm192_vm1, %v674_v31 }
  0x96   : > { %v836_v33 = vpop.permute.xlu1 %835  ;;  %1765 = vmatmul.mubr.msk.f32.vlgmr.msra.gmra.mxu0 %vm188_vm2, %v1762_v19  ;;  %v840_v34 = vpop.permute.xlu0 %839 }
  0x97   : > { %1770 = vmatpush1.msk.msra.mxu0 %vm192_vm1, %v673_v32  ;;  %v843_v36 = vsel %vm841_vm6, %v838_v29, %v840_v34  ;;  %1845 = vmatpush3.msk.msra.mxu1 %vm192_vm1, %v840_v34  ;;  %v842_v37 = vsel %vm841_vm6, %v836_v33, %v838_v29 }
  0x98   : > { %1775 = vmatprep.subr.msk.mxu0 %vm192_vm1, %v843_v36  ;;  %748 = vmatprep.mubr.f32.mxu0 %v1900_v0 }
  0x99   : > { %1847 = vmatmul.mubr.msk.f32.vlgmr.msra.gmra.mxu1 %vm188_vm2, %v1774_v35  ;;  %1849 = vmatprep.subr.mxu1 %v1900_v0 }
  0x9a   : > { %v1009_v38 = vpop.permute.xlu1 %1008  ;;  %1771 = vmatmul.mubr.msk.f32.vlgmr.msra.gmra.mxu0 %vm188_vm2, %v1768_v26  ;;  %v1007_v39 = vpop.permute.xlu0 %1006  ;;  %1851 = vmatprep.mubr.msk.f32.mxu1 %vm1901_vm0, %v1900_v0 }
  0x9b   : > { %1776 = vmatpush1.msk.msra.mxu0 %vm192_vm1, %v842_v37  ;;  %v1012_v41 = vsel %vm1010_vm7, %v1007_v39, %v1009_v38  ;;  %1850 = vmatpush3.msk.msra.mxu1 %vm192_vm1, %v1009_v38 }
  0x9c   : > { %1781 = vmatprep.subr.msk.mxu0 %vm192_vm1, %v1012_v41  ;;  %917 = vmatprep.mubr.f32.mxu0 %v1900_v0 }
  0x9d   : > { %1852 = vmatmul.mubr.msk.f32.vlgmr.msra.gmra.mxu1 %vm188_vm2, %v1780_v40  ;;  %1854 = vmatprep.subr.mxu1 %v1900_v0 }
  0x9e   : > { %v1176_v42 = vpop.permute.xlu1 %1175  ;;  %1777 = vmatmul.mubr.msk.f32.vlgmr.msra.gmra.mxu0 %vm188_vm2, %v1774_v35  ;;  %v1005_v43 = vpop.permute.xlu0 %1004  ;;  %1856 = vmatprep.mubr.msk.f32.mxu1 %vm1901_vm0, %v1900_v0 }
  0x9f   : > { %v1011_v44 = vsel %vm1010_vm7, %v1005_v43, %v1007_v39  ;;  %1086 = vmatprep.mubr.f32.mxu0 %v1900_v0 }
  0xa0   : > { %1782 = vmatpush1.msk.msra.mxu0 %vm192_vm1, %v1011_v44 }
  0xa2   : > { %v1174_v46 = vpop.permute.xlu1 %1173  ;;  %1783 = vmatmul.mubr.msk.f32.vlgmr.msra.gmra.mxu0 %vm188_vm2, %v1780_v40  ;;  %v1178_v47 = vpop.permute.xlu0 %1177 }
  0xa3   : > { %v1180_v48 = vsel %vm1179_vm8, %v1174_v46, %v1176_v42  ;;  %v1181_v49 = vsel %vm1179_vm8, %v1176_v42, %v1178_v47  ;;  %1855 = vmatpush3.msk.msra.mxu1 %vm192_vm1, %v1178_v47  ;;  %1255 = vmatprep.mubr.f32.mxu0 %v1900_v0 }
  0xa4   : > { %1787 = vmatprep.subr.msk.mxu0 %vm192_vm1, %v1181_v49  ;;  %1857 = vmatmul.mubr.msk.f32.vlgmr.msra.gmra.mxu1 %vm188_vm2, %v1786_v45 }
  0xa5   : > { %1788 = vmatpush1.msk.msra.mxu0 %vm192_vm1, %v1180_v48  ;;  %1859 = vmatprep.subr.mxu1 %v1900_v0 }
  0xa6   : > { %v1347_v51 = vpop.permute.xlu1 %1346  ;;  %1789 = vmatmul.mubr.msk.f32.vlgmr.msra.gmra.mxu0 %vm188_vm2, %v1786_v45  ;;  %v1345_v52 = vpop.permute.xlu0 %1344  ;;  %1861 = vmatprep.mubr.msk.f32.mxu1 %vm1901_vm0, %v1900_v0 }
  0xa7   : > { %v1350_v53 = vsel %vm1348_vm9, %v1345_v52, %v1347_v51  ;;  %1860 = vmatpush3.msk.msra.mxu1 %vm192_vm1, %v1347_v51  ;;  %1424 = vmatprep.mubr.f32.mxu0 %v1900_v0 }
  0xa8   : > { %1793 = vmatprep.subr.msk.mxu0 %vm192_vm1, %v1350_v53  ;;  %1862 = vmatmul.mubr.msk.f32.vlgmr.msra.gmra.mxu1 %vm188_vm2, %v1792_v50 }
  0xa9   : > { %1864 = vmatprep.subr.mxu1 %v1900_v0  ;;  %1866 = vmatprep.mubr.msk.f32.mxu1 %vm1901_vm0, %v1900_v0 }
  0xaa   : > { %v1514_v54 = vpop.permute.xlu1 %1513  ;;  %v1343_v55 = vpop.permute.xlu0 %1342 }
  0xab   : > { %v1349_v56 = vsel %vm1348_vm9, %v1343_v55, %v1345_v52 }
  0xac   : > { %1794 = vmatpush1.msk.msra.mxu0 %vm192_vm1, %v1349_v56 }
  0xad   : > { %1795 = vmatmul.mubr.msk.f32.vlgmr.msra.gmra.mxu0 %vm188_vm2, %v1792_v50 }
  0xae   : > { %v1512_v58 = vpop.permute.xlu1 %1511  ;;  %v1516_v59 = vpop.permute.xlu0 %1515  ;;  %1593 = vmatprep.mubr.f32.mxu0 %v1900_v0 }
  0xaf   : > { %v1518_v60 = vsel %vm1517_vm10, %v1512_v58, %v1514_v54  ;;  %v1519_v61 = vsel %vm1517_vm10, %v1514_v54, %v1516_v59  ;;  %1865 = vmatpush3.msk.msra.mxu1 %vm192_vm1, %v1516_v59 }
  0xb0   : > { %1799 = vmatprep.subr.msk.mxu0 %vm192_vm1, %v1519_v61  ;;  %1867 = vmatmul.mubr.msk.f32.vlgmr.msra.gmra.mxu1 %vm188_vm2, %v1798_v57 }
  0xb1   : > { %1800 = vmatpush1.msk.msra.mxu0 %vm192_vm1, %v1518_v60 }
  0xb2   : > { %1801 = vmatmul.mubr.msk.f32.vlgmr.msra.gmra.mxu0 %vm188_vm2, %v1798_v57 }
  0xbb   : > { %v1677_v49 = vpop.permute.xlu0 %1676 }
 0x144   : > { %v336_v62 = vpop.f32.mrf.mxu1 }
 0x146   : > { %v1828_v63 = vpop.f32.mrf.mxu1 }
 0x148   : > { %v486_v1 = vpop.f32.mrf.mxu1 }
 0x149   : > { %v487_v14 = vadd.f32 %v486_v1, %v336_v62 }
 0x14a   : > { %v1833_v2 = vpop.f32.mrf.mxu1 }
 0x14c   : > { %v652_v3 = vpop.f32.mrf.mxu1 }
 0x14d   : > { %v658_v19 = vadd.f32 %v652_v3, %v487_v14 }
 0x14e   : > { %v265_v4 = vpop.f32.mrf.mxu0  ;;  %v1838_v5 = vpop.f32.mrf.mxu1 }
 0x150   : > { %v267_v0 = vpop.f32.mrf.mxu0 }
 0x151   : > { %v821_v6 = vpop.f32.mrf.mxu1 }
 0x152   : > { %v415_v7 = vpop.f32.mrf.mxu0  ;;  %v827_v23 = vadd.f32 %v821_v6, %v658_v19 }
 0x153   : > { %v1843_v8 = vpop.f32.mrf.mxu1  ;;  %v416_v26 = vadd.f32 %v415_v7, %v265_v4 }
 0x154   : > { %v417_v9 = vpop.f32.mrf.mxu0 }
 0x155   : > { %v418_v28 = vadd.f32 %v417_v9, %v267_v0 }
 0x156   : > { %v581_v10 = vpop.f32.mrf.mxu0 }
 0x157   : > { %v656_v29 = vadd.f32 %v581_v10, %v416_v26 }
 0x158   : > { %v583_v11 = vpop.f32.mrf.mxu0 }
 0x159   : > { %v990_v12 = vpop.f32.mrf.mxu1  ;;  %v657_v33 = vadd.f32 %v583_v11, %v418_v28 }
 0x15a   : > { %v750_v13 = vpop.f32.mrf.mxu0  ;;  %v996_v30 = vadd.f32 %v990_v12, %v827_v23 }
 0x15b   : > { %v1848_v15 = vpop.f32.mrf.mxu1  ;;  %v825_v34 = vadd.f32 %v750_v13, %v656_v29 }
 0x15c   : > { %v752_v16 = vpop.f32.mrf.mxu0 }
 0x15d   : > { %v1159_v17 = vpop.f32.mrf.mxu1  ;;  %v826_v36 = vadd.f32 %v752_v16, %v657_v33 }
 0x15e   : > { %v919_v18 = vpop.f32.mrf.mxu0  ;;  %v1165_v38 = vadd.f32 %v1159_v17, %v996_v30 }
 0x15f   : > { %v1853_v20 = vpop.f32.mrf.mxu1  ;;  %v994_v37 = vadd.f32 %v919_v18, %v825_v34 }
 0x160   : > { %v921_v21 = vpop.f32.mrf.mxu0 }
 0x161   : > { %v995_v40 = vadd.f32 %v921_v21, %v826_v36 }
 0x162   : > { %v1088_v22 = vpop.f32.mrf.mxu0 }
 0x163   : > { %v1163_v41 = vadd.f32 %v1088_v22, %v994_v37 }
 0x164   : > { %v1090_v24 = vpop.f32.mrf.mxu0  ;;  %v1328_v25 = vpop.f32.mrf.mxu1 }
 0x165   : > { %v1334_v42 = vadd.f32 %v1328_v25, %v1165_v38  ;;  %v1164_v44 = vadd.f32 %v1090_v24, %v995_v40 }
 0x166   : > { %v1858_v27 = vpop.f32.mrf.mxu1  ;;  %v1257_v31 = vpop.f32.mrf.mxu0 }
 0x167   : > { %v1332_v45 = vadd.f32 %v1257_v31, %v1163_v41 }
 0x168   : > { %v1497_v32 = vpop.f32.mrf.mxu1  ;;  %v1259_v39 = vpop.f32.mrf.mxu0 }
 0x169   : > { %v1503_v46 = vadd.f32 %v1497_v32, %v1334_v42  ;;  %v1333_v50 = vadd.f32 %v1259_v39, %v1164_v44 }
 0x16a   : > { %v1863_v35 = vpop.f32.mrf.mxu1 }
 0x16d   : > { %v1426_v43 = vpop.f32.mrf.mxu0 }
 0x16e   : > { %v1501_v51 = vadd.f32 %v1426_v43, %v1332_v45 }
 0x16f   : > { %v1428_v47 = vpop.f32.mrf.mxu0 }
 0x170   : > { %v1666_v48 = vpop.f32.mrf.mxu1  ;;  %v1502_v55 = vadd.f32 %v1428_v47, %v1333_v50 }
 0x171   : > { %v1672_v52 = vadd.f32 %v1666_v48, %v1503_v46 }
 0x172   : > { %v1595_v53 = vpop.f32.mrf.mxu0  ;;  %v1868_v54 = vpop.f32.mrf.mxu1 }
 0x173   : > { %v1670_v56 = vadd.f32 %v1595_v53, %v1501_v51  ;;  %v1681_v57 = vadd.f32 %v1677_v49, %v1672_v52 }
 0x174   : > { %v1597_v58 = vpop.f32.mrf.mxu0 }
 0x175   : > { %v1679_v59 = vadd.f32 %v1677_v49, %v1670_v56  ;;  %v1684_v60 = vmax.f32 %v1681_v57, 0.0  ;;  %v1671_v61 = vadd.f32 %v1597_v58, %v1502_v55 }
 0x177   : > { %v1682_v62 = vmax.f32 %v1679_v59, 0.0  ;;  %1688 = vst.msk [vmem:[%s170_s24 + $0x10] sm:$0xff] %vm1687_vm11, %v1684_v60  ;;  %v1680_v63 = vadd.f32 %v1677_v49, %v1671_v61 }
 0x179   : > { %1685 = vst [vmem:[%s170_s24] sm:$0xff] %v1682_v62  ;;  %v1683_v1 = vmax.f32 %v1680_v63, 0.0 }
 0x17b   : > { %1686 = vst [vmem:[%s170_s24 + $0x8] sm:$0xff] %v1683_v1 }
 0x17c PF: > { %s13_s12 = sadd.s32 1, %s1898_s12  }
 0x17d   : > { %p10_p4 = scmp.ge.s32.totalorder %s13_s12, 4  }
 0x17f   :  { %12 = sbr.rel (!%p10_p4) target bundleno = 1 (0x1), region = 70 }

</bundles_post_ra>
